<compile_context>
chip_gen: v7x
topology: tpu7x:2x2x1
jax: 0.10.0
libtpu: 0.0.40
codegen_flags: <defaults>
</compile_context>

<pallas_src>
import functools

import jax
import jax.numpy as jnp
from jax import lax
from jax.experimental import pallas as pl
from jax.experimental.pallas import tpu as pltpu


def _round_up(x, m):
    return ((x + m - 1) // m) * m


def _cdiv(a, b):
    return -(-a // b)


# Contract dim 1 of x (tm, tk) with dim 1 of w (tn, tk) -> (tm, tn), i.e.
# x @ w.T with the transpose handled on the MXU load path, not by a host copy.
_DOT_DIMS = (((1,), (1,)), ((), ()))


# ---------------------------------------------------------------------------
# Kernels
# ---------------------------------------------------------------------------
def _lm_head_kernel_single_k(x_ref, w_ref, o_ref):
    # Whole reduction in one block: no accumulator round-trip, store directly.
    o_ref[...] = lax.dot_general(
        x_ref[...],
        w_ref[...],
        dimension_numbers=_DOT_DIMS,
        preferred_element_type=jnp.float32,
    ).astype(o_ref.dtype)


def _lm_head_kernel_tiled_k(x_ref, w_ref, o_ref, acc_ref, *, tk):
    # x_ref holds the full-K activation strip (tm, K); only the weight is
    # tiled along K, so the activation is DMA'd once per M tile.
    k = pl.program_id(2)

    @pl.when(k == 0)
    def _():
        acc_ref[...] = jnp.zeros_like(acc_ref)

    k_off = pl.multiple_of(k * tk, tk)
    acc_ref[...] += lax.dot_general(
        x_ref[:, pl.ds(k_off, tk)],
        w_ref[...],
        dimension_numbers=_DOT_DIMS,
        preferred_element_type=jnp.float32,
    )

    @pl.when(k == pl.num_programs(2) - 1)
    def _():
        o_ref[...] = acc_ref[...].astype(o_ref.dtype)


# ---------------------------------------------------------------------------
# Tile / VMEM planning
# ---------------------------------------------------------------------------
@functools.lru_cache(maxsize=None)
def _vmem_budget():
    """Per-generation VMEM budget (bytes) for the double-buffered working set."""
    cap = None
    try:
        info = pltpu.get_tpu_info()
        cap = getattr(info, "vmem_capacity_bytes", None)
    except Exception:
        cap = None
    if not cap:
        cap = 64 << 20  # conservative fallback (v7x-sized)
    # ~85% of physical leaves headroom for Mosaic internal scratch; the extra
    # 100 MiB cap lets v5e/v6e (128 MiB) use big tiles while v7x (64 MiB)
    # lands around ~54 MiB.
    return int(min(int(cap) * 0.85, 100 << 20))


def _choose_tiles(M, K, V_pad, *, in_bytes, out_bytes, vmem_budget):
    """Pick (tm, tn, tk, m_pad) for an (M, K) x (V_pad, K)^T matmul."""
    # Vocab tile: lane-dense; 512/256 keep the 256-wide v6e/v7x MXU output
    # axis full (384 deliberately excluded).
    tn = 128
    for cand in (512, 256):
        if V_pad % cand == 0:
            tn = cand
            break

    m16 = _round_up(max(M, 1), 16)  # bf16 sublane packing: 16-row granules

    def working_set(tm, tk):
        if tk == K:
            # single-K: double-buffered x strip + weight tile + output tile
            return (2 * tm * K + 2 * tn * K) * in_bytes + 2 * tm * tn * out_bytes
        # tiled-K: full-K activation strip resident, weight tiled along K,
        # plus the f32 accumulator scratch.
        return ((2 * tm * K + 2 * tn * tk) * in_bytes
                + 2 * tm * tn * out_bytes + tm * tn * 4)

    # Reduction tiling: prefer the single-K fast path (no accumulator RMW,
    # no pl.when branches, contiguous weight-row DMAs) whenever it fits the
    # VMEM budget even at the smallest M tile; only then tile K.
    if working_set(16, K) <= vmem_budget:
        tk = K
    else:
        tk = K
        for cand in (2048, 1024, 512, 256):
            if K % cand == 0:
                tk = cand
                break

    # Largest M tile (multiple of 16, capped at 2048) that fits the budget.
    tm_cap = min(m16, 2048)
    tm_cap -= tm_cap % 16
    while tm_cap > 16 and working_set(tm_cap, tk) > vmem_budget:
        tm_cap -= 16
    tm_cap = max(tm_cap, 16)

    # Balance the M tiles instead of padding up to a whole extra tile.
    n_tiles = _cdiv(m16, tm_cap)
    tm = _round_up(_cdiv(m16, n_tiles), 16)
    m_pad = tm * n_tiles
    return tm, tn, tk, m_pad


# ---------------------------------------------------------------------------
# pallas_call wrapper
# ---------------------------------------------------------------------------
def _pallas_lm_head_matmul(x, w, *, tm, tn, tk, out_dtype, vmem_budget):
    """x: (M, K), w: (N, K)  ->  (M, N) == x @ w.T, f32 accumulation."""
    M, K = x.shape
    N, K2 = w.shape
    assert K == K2
    assert M % tm == 0 and N % tn == 0 and K % tk == 0

    nk = K // tk
    in_bytes = jnp.dtype(x.dtype).itemsize
    out_bytes = jnp.dtype(out_dtype).itemsize

    if nk == 1:
        working = (2 * tm * K + 2 * tn * K) * in_bytes + 2 * tm * tn * out_bytes
    else:
        working = ((2 * tm * K + 2 * tn * tk) * in_bytes
                   + 2 * tm * tn * out_bytes + tm * tn * 4)
    vmem_limit = int(min(max(2 * working, 16 << 20), vmem_budget))

    # x streamed once per M tile, weight streamed once per M tile, output
    # written once.  Lets XLA overlap the surrounding reshape/pad/slice.
    cost = pl.CostEstimate(
        flops=2 * M * N * K,
        transcendentals=0,
        bytes_accessed=int(M * K * in_bytes
                           + (M // tm) * N * K * in_bytes
                           + M * N * out_bytes),
    )

    if nk == 1:
        # NOTE: vocab axis is the inner grid axis, so the x block index (i, 0)
        # is constant across consecutive steps and Pallas skips its re-DMA;
        # only the weight streams.  Both axes "parallel" for megacore (v7x).
        return pl.pallas_call(
            _lm_head_kernel_single_k,
            out_shape=jax.ShapeDtypeStruct((M, N), out_dtype),
            grid_spec=pltpu.PrefetchScalarGridSpec(
                num_scalar_prefetch=0,
                grid=(M // tm, N // tn),
                in_specs=[
                    pl.BlockSpec((tm, K), lambda i, j: (i, 0)),
                    pl.BlockSpec((tn, K), lambda i, j: (j, 0)),
                ],
                out_specs=pl.BlockSpec((tm, tn), lambda i, j: (i, j)),
            ),
            compiler_params=pltpu.CompilerParams(
                dimension_semantics=("parallel", "parallel"),
                vmem_limit_bytes=vmem_limit,
            ),
            cost_estimate=cost,
        )(x, w)

    kernel = functools.partial(_lm_head_kernel_tiled_k, tk=tk)
    return pl.pallas_call(
        kernel,
        out_shape=jax.ShapeDtypeStruct((M, N), out_dtype),
        grid_spec=pltpu.PrefetchScalarGridSpec(
            num_scalar_prefetch=0,
            grid=(M // tm, N // tn, nk),
            in_specs=[
                # Full-K activation strip: block index constant across (j, k),
                # so it is DMA'd once per M tile (no per-(j,k) re-stream).
                pl.BlockSpec((tm, K), lambda i, j, k: (i, 0)),
                pl.BlockSpec((tn, tk), lambda i, j, k: (j, k)),
            ],
            out_specs=pl.BlockSpec((tm, tn), lambda i, j, k: (i, j)),
            scratch_shapes=[pltpu.VMEM((tm, tn), jnp.float32)],
        ),
        compiler_params=pltpu.CompilerParams(
            dimension_semantics=("parallel", "parallel", "arbitrary"),
            vmem_limit_bytes=vmem_limit,
        ),
        cost_estimate=cost,
    )(x, w)


# ---------------------------------------------------------------------------
# Public API
# ---------------------------------------------------------------------------
def prepare_decoder_weight(embed_weight, dtype=jnp.bfloat16):
    """One-time (parameter-init) prep of the tied embedding weight.

    Casts to bf16 and pads the vocab axis to a lane/MXU-friendly multiple so
    the per-step forward never re-materializes a full (V, E) copy.
    """
    V, E = embed_weight.shape
    v_pad = _round_up(V, 512) if V >= 512 else _round_up(V, 128)
    w = embed_weight.astype(dtype)
    if v_pad != V:
        w = jnp.pad(w, ((0, v_pad - V), (0, 0)))
    return w


@functools.partial(
    jax.jit, static_argnames=("vocab_size", "trunc_and_reshape", "out_dtype"))
def lm_head_forward(h, w_prepared, *, vocab_size, trunc_and_reshape=True,
                    out_dtype=jnp.bfloat16):
    """Pallas LMHead forward.

    h:           (B, T, E) activations
    w_prepared:  prepare_decoder_weight(embed_weight) — bf16, vocab-padded (V_pad, E)
    vocab_size:  true vocab size V (static)
    returns:     (B*(T-1), V) if trunc_and_reshape else h.shape[:-1] + (V,)
    """
    E = h.shape[-1]
    V_pad, E2 = w_prepared.shape
    assert E == E2, (E, E2)

    if trunc_and_reshape:
        x = h[:, :-1].reshape(-1, E)
        lead_shape = None
    else:
        x = h.reshape(-1, E)
        lead_shape = h.shape[:-1]
    M = x.shape[0]

    # bf16 activations, f32 accumulation inside the kernel.  The weight was
    # already cast/padded once at init.
    x = x.astype(w_prepared.dtype)

    budget = _vmem_budget()
    in_bytes = jnp.dtype(x.dtype).itemsize
    out_bytes = jnp.dtype(out_dtype).itemsize
    tm, tn, tk, m_pad = _choose_tiles(
        M, E, V_pad, in_bytes=in_bytes, out_bytes=out_bytes, vmem_budget=budget)

    if m_pad != M:
        x = jnp.pad(x, ((0, m_pad - M), (0, 0)))

    out = _pallas_lm_head_matmul(
        x, w_prepared, tm=tm, tn=tn, tk=tk, out_dtype=out_dtype,
        vmem_budget=budget)

    logits = out[:M, :vocab_size]
    if lead_shape is not None:
        logits = logits.reshape(*lead_shape, vocab_size)
    return logits


if __name__ == "__main__":
    # Small shapes implied by the module: batch=2, seq=8, n_embd=32, vocab=256.
    B, T, E, V = 2, 8, 32, 256

    key = jax.random.PRNGKey(0)
    k_h, k_w = jax.random.split(key)
    h = jax.random.normal(k_h, (B, T, E), dtype=jnp.float32)
    # Tied embedding weight (deterministic init, ~ N(0, 0.02) like GPT embeds).
    embed_weight = 0.02 * jax.random.normal(k_w, (V, E), dtype=jnp.float32)

    # One-time weight prep (parameter init), outside the jitted forward.
    w_prepared = prepare_decoder_weight(embed_weight)

    logits = lm_head_forward(h, w_prepared, vocab_size=V,
                             trunc_and_reshape=True)
    logits = jax.block_until_ready(logits)

    assert logits.shape == (B * (T - 1), V), logits.shape
    assert logits.dtype == jnp.bfloat16, logits.dtype

    # Cross-check against plain-JAX references of the PyTorch semantics.
    x_ref = h[:, :-1].reshape(-1, E)
    ref_f32 = x_ref @ embed_weight.T
    ref_bf16 = (x_ref.astype(jnp.bfloat16).astype(jnp.float32)
                @ embed_weight.astype(jnp.bfloat16).astype(jnp.float32).T)

    got = logits.astype(jnp.float32)
    # vs. bf16-rounded inputs (f32 accumulation in both; output bf16-rounded).
    assert jnp.allclose(got, ref_bf16, atol=1e-2, rtol=5e-2), (
        float(jnp.max(jnp.abs(got - ref_bf16))))
    # Loose check vs. full-f32 reference (bf16 input/output rounding only).
    assert jnp.allclose(got, ref_f32, atol=3e-2, rtol=3e-2), (
        float(jnp.max(jnp.abs(got - ref_f32))))

    print("KERNEL_OK")
</pallas_src>

<mosaic_0001>
module attributes {stable_mosaic.version = 11 : i64} {
  func.func @_lm_head_kernel_single_k(%arg0: i32, %arg1: i32, %arg2: memref<16x32xbf16, #tpu.memory_space<vmem>>, %arg3: memref<256x32xbf16, #tpu.memory_space<vmem>>, %arg4: memref<16x256xbf16, #tpu.memory_space<vmem>>) attributes {dimension_semantics = [#tpu.dimension_semantics<parallel>, #tpu.dimension_semantics<parallel>], iteration_bounds = array<i64: 1, 1>, scalar_prefetch = 0 : i64, scratch_operands = 0 : i64, tpu.core_type = #tpu.core_type<tc>, window_params = [{transform_indices = @transform_0, window_bounds = array<i64: 16, 32>}, {transform_indices = @transform_1, window_bounds = array<i64: 256, 32>}, {transform_indices = @transform_2, window_bounds = array<i64: 16, 256>}]} {
    %c0 = arith.constant 0 : index
    %c0_0 = arith.constant 0 : index
    %0 = vector.load %arg2[%c0, %c0_0] : memref<16x32xbf16, #tpu.memory_space<vmem>>, vector<16x32xbf16>
    %c0_1 = arith.constant 0 : index
    %c0_2 = arith.constant 0 : index
    %1 = vector.load %arg3[%c0_1, %c0_2] : memref<256x32xbf16, #tpu.memory_space<vmem>>, vector<256x32xbf16>
    %cst = arith.constant dense<0.000000e+00> : vector<16x256xf32>
    %2 = tpu.matmul %0, %1, %cst {dimension_numbers = #tpu.dot_dimension_numbers<[1], [1], [0], [0], [0, 0, 1, 0], [], []>} : vector<16x32xbf16>, vector<256x32xbf16>, vector<16x256xf32> -> vector<16x256xf32>
    %3 = arith.truncf %2 : vector<16x256xf32> to vector<16x256xbf16>
    %c0_3 = arith.constant 0 : index
    %c0_4 = arith.constant 0 : index
    %4 = vector.load %arg4[%c0_3, %c0_4] : memref<16x256xbf16, #tpu.memory_space<vmem>>, vector<16x256xbf16>
    tpu.vector_store %arg4[%c0_3, %c0_4], %3 {strides = array<i32>} : memref<16x256xbf16, #tpu.memory_space<vmem>>, vector<16x256xbf16>,
    return
  }
  func.func @transform_0(%arg0: i32, %arg1: i32) -> (i32, i32) {
    %c0_i32 = arith.constant 0 : i32
    %c0_i32_0 = arith.constant 0 : i32
    return %arg0, %c0_i32 : i32, i32
  }
  func.func @transform_1(%arg0: i32, %arg1: i32) -> (i32, i32) {
    %c0_i32 = arith.constant 0 : i32
    %c0_i32_0 = arith.constant 0 : i32
    return %arg1, %c0_i32 : i32, i32
  }
  func.func @transform_2(%arg0: i32, %arg1: i32) -> (i32, i32) {
    %c0_i32 = arith.constant 0 : i32
    return %arg0, %arg1 : i32, i32
  }
}

</mosaic_0001>

<bundles_post_ra>
// kernel: lm_head_forward.1
= control target key start
LH: loop header
LB: loop body
LE: loop exit
PB: predicated region body
PF: predicated region fallthrough
CT: control target
= control target key end

     0   :  { %vm132_vm0 = vcmask 261120   ;;  %s448_s0 = inlined_call_operand.vmem [shape: bf16[16,32], index: 0, kind: input, shape index: {}]   ;;  %s449_s1 = inlined_call_operand.vmem [shape: bf16[256,32], index: 1, kind: input, shape index: {}]   ;;  %s450_s2 = inlined_call_operand.hbm [shape: bf16[16,256], index: 2, kind: output, shape index: {}]  }
   0x1   :  { %v308_v0 = vld [vmem:[%s449_s1 + $0x40] sm:$0xff]   ;;  %v310_v2 = vld [vmem:[%s449_s1 + $0x48] sm:$0xff]   ;;  %v312_v6 = vld [vmem:[%s449_s1 + $0x50] sm:$0xff]  }
   0x2   :  { %v309_v1 = vld [vmem:[%s449_s1] sm:$0xff]   ;;  %297 = vmatprep.subr.msk.bf16.mxu0 %vm132_vm0, %v308_v0  ;;  %v311_v4 = vld [vmem:[%s449_s1 + $0x8] sm:$0xff]   ;;  %v313_v7 = vld [vmem:[%s449_s1 + $0x10] sm:$0xff]  }
   0x3   :  { %v137_v3 = vsel %vm132_vm0, %v309_v1, 0  ;;  %v140_v5 = vsel %vm132_vm0, %v311_v4, 0  ;;  %v324_v8 = vld [vmem:[%s448_s0] sm:$0xff]   ;;  %v143_v9 = vsel %vm132_vm0, %v313_v7, 0  ;;  %v314_v10 = vld [vmem:[%s449_s1 + $0x58] sm:$0xff]  }
   0x4   :  { %280 = vmatpush3.bf16.xpose.msra.mxu0 %v137_v3 }
   0x5   :  { %298 = vmatprep.subr.msk.bf16.mxu0 %vm132_vm0, %v310_v2 }
   0xc   :  { %282 = vmatpush3.bf16.xpose.msra.mxu0 %v140_v5 }
   0xd   :  { %299 = vmatprep.subr.msk.bf16.mxu0 %vm132_vm0, %v312_v6 }
   0xe   :  { %7 = vsyncpa [#allocation3], 0  ;;  %295 = vmatprep.mubr.msk.bf16.mxu0 %vm132_vm0, %v324_v8  ;;  %v315_v11 = vld [vmem:[%s449_s1 + $0x18] sm:$0xff]   ;;  %v316_v13 = vld [vmem:[%s449_s1 + $0x60] sm:$0xff]   ;;  %s349_s14 = smov [#allocation2]  }
   0xf   :  { %v146_v12 = vsel %vm132_vm0, %v315_v11, 0  ;;  %v317_v14 = vld [vmem:[%s449_s1 + $0x20] sm:$0xff]   ;;  %v318_v16 = vld [vmem:[%s449_s1 + $0x68] sm:$0xff]   ;;  %v320_v19 = vld [vmem:[%s449_s1 + $0x70] sm:$0xff]   ;;  %s246_s15 = sshll.u32 %s349_s14, 4  ;;  %s247_s15 = int_to_ptr.vmem [resolvable:$true] %s246_s15 }
  0x10   :  { %v149_v15 = vsel %vm132_vm0, %v317_v14, 0  ;;  %v319_v17 = vld [vmem:[%s449_s1 + $0x28] sm:$0xff]   ;;  %v321_v20 = vld [vmem:[%s449_s1 + $0x30] sm:$0xff]   ;;  %v322_v22 = vld [vmem:[%s449_s1 + $0x78] sm:$0xff]   ;;  %s325_s16 = scalar_lea.vmem %s247_s15, 256  ;;  %p330_p1 = scmp.lt.s32.totalorder %s247_s15, %s247_s15 }
  0x11   :  { %v152_v18 = vsel %vm132_vm0, %v319_v17, 0  ;;  %v155_v21 = vsel %vm132_vm0, %v321_v20, 0  ;;  %v323_v23 = vld [vmem:[%s449_s1 + $0x38] sm:$0xff]   ;;  %p326_p0 = scmp.ne.s32.totalorder %s247_s15, %s325_s16  ;;  %p331_p2 = scmp.lt.s32.totalorder %s325_s16, %s325_s16 }
  0x12   :  { %v158_v24 = vsel %vm132_vm0, %v323_v23, 0 }
  0x13   :  { %p332_p3 = por %p331_p2, %p330_p1 }
  0x14   :  { %284 = vmatpush3.bf16.xpose.msra.mxu0 %v143_v9 }
  0x15   :  { %300 = vmatprep.subr.msk.bf16.mxu0 %vm132_vm0, %v314_v10  ;;  %p333_p4 = pnand %p332_p3, %p326_p0 }
  0x1c   :  { %286 = vmatpush3.bf16.xpose.msra.mxu0 %v146_v12 }
  0x1d   :  { %301 = vmatprep.subr.msk.bf16.mxu0 %vm132_vm0, %v316_v13 }
  0x24   :  { %288 = vmatpush3.bf16.xpose.msra.mxu0 %v149_v15 }
  0x25   :  { %302 = vmatprep.subr.msk.bf16.mxu0 %vm132_vm0, %v318_v16 }
  0x2c   :  { %290 = vmatpush3.bf16.xpose.msra.mxu0 %v152_v18 }
  0x2d   :  { %303 = vmatprep.subr.msk.bf16.mxu0 %vm132_vm0, %v320_v19 }
  0x34   :  { %292 = vmatpush3.bf16.xpose.msra.mxu0 %v155_v21 }
  0x35   :  { %304 = vmatprep.subr.msk.bf16.mxu0 %vm132_vm0, %v322_v22 }
  0x3c   :  { %294 = vmatpush3.bf16.xpose.msra.mxu0 %v158_v24 }
  0x43   :  { %296 = vmatmul.mubr.msk.bf16.vlgmr.msra.gmra.mrb[0].mxu0 %vm132_vm0, %v324_v8 }
 0x116   :  { %v218_v25 = vpop.f32.mrb[0].mxu0 }
 0x117   :  { %v220_v26 = vpop.f32.mrb[1].mxu0 }
 0x118   :  { %v277_v27 = vpack.c.bf16 %v220_v26, %v218_v25  ;;  %v222_v28 = vpop.f32.mrb[2].mxu0 }
 0x119   :  { %v224_v29 = vpop.f32.mrb[3].mxu0 }
 0x11a   :  { %239 = vst [vmem:[#allocation2] sm:$0xff] %v277_v27  ;;  %v278_v30 = vpack.c.bf16 %v224_v29, %v222_v28 }
 0x11c   :  { %240 = vst [vmem:[#allocation2 + $0x8] sm:$0xff] %v278_v30 }
 0x11d   :  { %336 = shalt.err (!%p333_p4)
}
 0x11e   :  { %s337_s18 = scalar_lea.hbm %s450_s2, 256 }
 0x11f   :  { %p338_p5 = scmp.ne.s32.totalorder %s450_s2, %s337_s18  ;;  %p341_p6 = scmp.lt.u32.totalorder %s337_s18, %s450_s2 }
 0x121   :  { %p343_p7 = pnand %p341_p6, %p338_p5 }
 0x123   :  { %346 = shalt.err (!%p343_p7)
}
 0x124   :  { %s350_s23 = smov 128   ;;  %s351_s24 = smov 8  }
 0x125   :  { %252 = dma.vmem_to_hbm [thread:$0]  %s247_s15, 256, %s450_s2, [#allocation3], %s350_s23, %s350_s23, %s351_s24  }
 0x126   :  { %347 = dma.done.wait [#allocation3], 256  }
 0x127   :  { %348 = vsyncadd [#allocation3], 4294967040 }
 0x128   :  { %256 = vsyncpa [#allocation3], 1 }

</bundles_post_ra>
